<compile_context>
chip_gen: v7x
topology: tpu7x:2x2x1
jax: 0.10.0
libtpu: 0.0.40
codegen_flags: <defaults>
</compile_context>

<pallas_src>
import functools

import jax
import jax.numpy as jnp
from jax.experimental import pallas as pl
from jax.experimental.pallas import tpu as pltpu


def _make_rnn_kernel(n_layers: int, time_chunk: int):
    L = n_layers
    T = time_chunk

    def kernel(*refs):
        # refs: x, [w_ih, w_hh, b] * L, w_out, b_out, y, hid, act_scratch
        x_ref = refs[0]
        layer_refs = refs[1 : 1 + 3 * L]
        w_out_ref = refs[1 + 3 * L]
        b_out_ref = refs[2 + 3 * L]
        y_ref = refs[3 + 3 * L]
        hid_ref = refs[4 + 3 * L]
        act_scr = refs[5 + 3 * L]          # (T*Bc, H): current layer's chunk output

        c = pl.program_id(1)               # time-chunk axis (sequential)
        Bc = x_ref.shape[1]
        I = x_ref.shape[2]
        O = y_ref.shape[2]

        # Zero the recurrent state at the first chunk; the hidden-state output
        # block has a constant chunk index so it stays VMEM-resident and carries
        # the recurrence across chunks (no separate scratch needed).
        @pl.when(c == 0)
        def _():
            hid_ref[...] = jnp.zeros_like(hid_ref)

        for l in range(L):
            w_ih = layer_refs[3 * l + 0][...]   # (in_dim, H), pre-transposed
            w_hh = layer_refs[3 * l + 1][...]   # (H, H),      pre-transposed
            b = layer_refs[3 * l + 2][...]      # (1, H) = b_ih + b_hh

            if l == 0:
                x_in = x_ref[...].reshape(T * Bc, I)   # leading-dim merge: free
            else:
                x_in = act_scr[...]                    # (T*Bc, H)

            # Chunk-wide input projection: off the serial dependence chain.
            x_proj = jnp.dot(x_in, w_ih, preferred_element_type=jnp.float32) + b

            # Serial recurrence: only h @ W_hh per timestep (fully unrolled,
            # T is small and static -> static slices, LLO sees the whole chain).
            h = hid_ref[l]                              # (Bc, H)
            for t in range(T):
                h = jnp.tanh(
                    x_proj[t * Bc:(t + 1) * Bc, :]
                    + jnp.dot(h, w_hh, preferred_element_type=jnp.float32))
                act_scr[t * Bc:(t + 1) * Bc, :] = h
            hid_ref[l] = h

        # Output Linear hoisted to one (T*Bc, H) @ (H, O) matmul per chunk.
        y = (jnp.dot(act_scr[...], w_out_ref[...],
                     preferred_element_type=jnp.float32)
             + b_out_ref[...])
        y_ref[...] = y.reshape(T, Bc, O)                # leading-dim split: free

    return kernel


@functools.partial(jax.jit,
                   static_argnames=("n_layers", "time_chunk", "batch_shards"))
def rnn_forward(x, params, n_layers, time_chunk=None, batch_shards=1):
    """x: (B, S, I) batch_first, float32.  Returns (y: (B,S,O), hidden: (L,B,H)).

    batch_shards: set to 2 on v7x (two TensorCores) when B//2 is still a
    multiple of 8 sublanes; keep 1 on v5e/v6e.
    time_chunk: timesteps per grid step; re-derive against 64 MiB VMEM on v7x
    for large shapes (weights + 2x(x chunk) + 2x(y chunk) + state must fit).
    """
    B, S, I = x.shape
    H = params["w_hh"][0].shape[0]
    O = params["w_out"].shape[0]
    L = n_layers
    T = S if time_chunk is None else time_chunk
    assert S % T == 0 and B % batch_shards == 0
    Bc = B // batch_shards

    # Time-major layout so a chunk is one contiguous (T, B, I) tile.
    x_tm = jnp.transpose(x, (1, 0, 2))  # (S, B, I)

    # Pre-transpose weights to (in, out) and fuse the two biases per layer.
    # (bf16 cast of weights/activations is a worthwhile option on v6e/v7x, but
    #  it loosens the 1e-5 f32 tolerance, so f32 is kept here.)
    flat_inputs = [x_tm]
    in_specs = [pl.BlockSpec((T, Bc, I), lambda p, c: (c, p, 0))]
    for l in range(L):
        w_ih_t = params["w_ih"][l].T                          # (in_dim, H)
        w_hh_t = params["w_hh"][l].T                          # (H, H)
        b = (params["b_ih"][l] + params["b_hh"][l])[None, :]  # (1, H)
        flat_inputs += [w_ih_t, w_hh_t, b]
        in_specs += [
            pl.BlockSpec(w_ih_t.shape, lambda p, c: (0, 0)),
            pl.BlockSpec(w_hh_t.shape, lambda p, c: (0, 0)),
            pl.BlockSpec(b.shape, lambda p, c: (0, 0)),
        ]
    w_out_t = params["w_out"].T                               # (H, O)
    b_out = params["b_out"][None, :]                          # (1, O)
    flat_inputs += [w_out_t, b_out]
    in_specs += [
        pl.BlockSpec(w_out_t.shape, lambda p, c: (0, 0)),
        pl.BlockSpec(b_out.shape, lambda p, c: (0, 0)),
    ]
    # NOTE: at production sizes, add pipeline_mode=pl.Buffered(1) to the
    # constant-index weight specs to avoid pointless double-buffering of W_hh.

    out_shape = (
        jax.ShapeDtypeStruct((S, B, O), jnp.float32),  # y, time-major
        jax.ShapeDtypeStruct((L, B, H), jnp.float32),  # final hidden state
    )
    out_specs = (
        pl.BlockSpec((T, Bc, O), lambda p, c: (c, p, 0)),
        pl.BlockSpec((L, Bc, H), lambda p, c: (0, p, 0)),  # resident across chunks
    )

    y_tm, hidden = pl.pallas_call(
        _make_rnn_kernel(L, T),
        out_shape=out_shape,
        grid_spec=pltpu.PrefetchScalarGridSpec(
            num_scalar_prefetch=0,
            grid=(batch_shards, S // T),
            in_specs=in_specs,
            out_specs=out_specs,
            scratch_shapes=[pltpu.VMEM((T * Bc, H), jnp.float32)],
        ),
        compiler_params=pltpu.CompilerParams(
            # batch shards are independent (megacore on v7x); time chunks carry
            # the recurrence and must run in order.
            dimension_semantics=("parallel", "arbitrary"),
        ),
    )(*flat_inputs)

    return jnp.transpose(y_tm, (1, 0, 2)), hidden


def init_params(key, input_size, hidden_size, output_size, n_layers):
    """PyTorch-style uniform(-1/sqrt(H), 1/sqrt(H)) init, deterministic."""
    bound = 1.0 / jnp.sqrt(jnp.float32(hidden_size))
    keys = jax.random.split(key, 4 * n_layers + 2)
    w_ih, w_hh, b_ih, b_hh = [], [], [], []
    for l in range(n_layers):
        in_dim = input_size if l == 0 else hidden_size
        w_ih.append(jax.random.uniform(keys[4 * l + 0], (hidden_size, in_dim),
                                       jnp.float32, -bound, bound))
        w_hh.append(jax.random.uniform(keys[4 * l + 1], (hidden_size, hidden_size),
                                       jnp.float32, -bound, bound))
        b_ih.append(jax.random.uniform(keys[4 * l + 2], (hidden_size,),
                                       jnp.float32, -bound, bound))
        b_hh.append(jax.random.uniform(keys[4 * l + 3], (hidden_size,),
                                       jnp.float32, -bound, bound))
    w_out = jax.random.uniform(keys[-2], (output_size, hidden_size),
                               jnp.float32, -bound, bound)
    b_out = jax.random.uniform(keys[-1], (output_size,),
                               jnp.float32, -bound, bound)
    return dict(w_ih=w_ih, w_hh=w_hh, b_ih=b_ih, b_hh=b_hh,
                w_out=w_out, b_out=b_out)


def rnn_forward_ref(x, params, n_layers):
    """Pure-JAX reference of the PyTorch forward (eval mode, unidirectional)."""
    B, S, I = x.shape
    H = params["w_hh"][0].shape[0]
    h = jnp.zeros((n_layers, B, H), jnp.float32)
    ys = []
    for t in range(S):
        inp = x[:, t, :]
        new_h = []
        for l in range(n_layers):
            hl = jnp.tanh(inp @ params["w_ih"][l].T + params["b_ih"][l]
                          + h[l] @ params["w_hh"][l].T + params["b_hh"][l])
            new_h.append(hl)
            inp = hl
        h = jnp.stack(new_h, axis=0)
        ys.append(inp @ params["w_out"].T + params["b_out"])
    return jnp.stack(ys, axis=1), h


if __name__ == "__main__":
    # Small shapes consistent with the module: batch=8, seq=8, input=16,
    # hidden=32, output=16, n_layers=2, bidirectional=False.
    B, S, I, H, O, L = 8, 8, 16, 32, 16, 2

    key = jax.random.PRNGKey(0)
    k_x, k_p = jax.random.split(key)
    x = jax.random.normal(k_x, (B, S, I), jnp.float32)
    params = init_params(k_p, I, H, O, L)

    y, hidden = rnn_forward(x, params, L)
    y = jax.block_until_ready(y)
    hidden = jax.block_until_ready(hidden)

    y_ref, h_ref = rnn_forward_ref(x, params, L)
    assert y.shape == (B, S, O) and hidden.shape == (L, B, H)
    assert jnp.allclose(y, y_ref, atol=1e-5, rtol=1e-5)
    assert jnp.allclose(hidden, h_ref, atol=1e-5, rtol=1e-5)

    print("KERNEL_OK")
</pallas_src>

<mosaic_0001>
module attributes {stable_mosaic.version = 11 : i64} {
  func.func @kernel(%arg0: i32, %arg1: i32, %arg2: memref<8x8x16xf32, #tpu.memory_space<vmem>>, %arg3: memref<16x32xf32, #tpu.memory_space<vmem>>, %arg4: memref<32x32xf32, #tpu.memory_space<vmem>>, %arg5: memref<1x32xf32, #tpu.memory_space<vmem>>, %arg6: memref<32x32xf32, #tpu.memory_space<vmem>>, %arg7: memref<32x32xf32, #tpu.memory_space<vmem>>, %arg8: memref<1x32xf32, #tpu.memory_space<vmem>>, %arg9: memref<32x16xf32, #tpu.memory_space<vmem>>, %arg10: memref<1x16xf32, #tpu.memory_space<vmem>>, %arg11: memref<8x8x16xf32, #tpu.memory_space<vmem>>, %arg12: memref<2x8x32xf32, #tpu.memory_space<vmem>>, %arg13: memref<64x32xf32, #tpu.memory_space<vmem>>) attributes {dimension_semantics = [#tpu.dimension_semantics<parallel>, #tpu.dimension_semantics<arbitrary>], iteration_bounds = array<i64: 1, 1>, scalar_prefetch = 0 : i64, scratch_operands = 1 : i64, tpu.core_type = #tpu.core_type<tc>, window_params = [{transform_indices = @transform_0, window_bounds = array<i64: 8, 8, 16>}, {pipeline_mode = #tpu.pipeline_mode<synchronous>, transform_indices = @transform_1, window_bounds = array<i64: 16, 32>}, {pipeline_mode = #tpu.pipeline_mode<synchronous>, transform_indices = @transform_2, window_bounds = array<i64: 32, 32>}, {pipeline_mode = #tpu.pipeline_mode<synchronous>, transform_indices = @transform_3, window_bounds = array<i64: 1, 32>}, {pipeline_mode = #tpu.pipeline_mode<synchronous>, transform_indices = @transform_4, window_bounds = array<i64: 32, 32>}, {pipeline_mode = #tpu.pipeline_mode<synchronous>, transform_indices = @transform_5, window_bounds = array<i64: 32, 32>}, {pipeline_mode = #tpu.pipeline_mode<synchronous>, transform_indices = @transform_6, window_bounds = array<i64: 1, 32>}, {pipeline_mode = #tpu.pipeline_mode<synchronous>, transform_indices = @transform_7, window_bounds = array<i64: 32, 16>}, {pipeline_mode = #tpu.pipeline_mode<synchronous>, transform_indices = @transform_8, window_bounds = array<i64: 1, 16>}, {transform_indices = @transform_9, window_bounds = array<i64: 8, 8, 16>}, {transform_indices = @transform_10, window_bounds = array<i64: 2, 8, 32>}]} {
    %c0_i32 = arith.constant 0 : i32
    %0 = arith.cmpi eq, %arg1, %c0_i32 : i32
    %1 = arith.extui %0 : i1 to i32
    %c0_i32_0 = arith.constant 0 : i32
    %2 = arith.cmpi ne, %1, %c0_i32_0 : i32
    scf.if %2 {
      %cst_80 = arith.constant 0.000000e+00 : f32
      %116 = vector.broadcast %cst_80 : f32 to vector<2x8x32xf32>
      %c0_81 = arith.constant 0 : index
      %c0_82 = arith.constant 0 : index
      %c0_83 = arith.constant 0 : index
      %117 = vector.load %arg12[%c0_81, %c0_82, %c0_83] : memref<2x8x32xf32, #tpu.memory_space<vmem>>, vector<2x8x32xf32>
      tpu.vector_store %arg12[%c0_81, %c0_82, %c0_83], %116 {strides = array<i32>} : memref<2x8x32xf32, #tpu.memory_space<vmem>>, vector<2x8x32xf32>,
    } else {
    }
    %c0 = arith.constant 0 : index
    %c0_1 = arith.constant 0 : index
    %3 = vector.load %arg3[%c0, %c0_1] : memref<16x32xf32, #tpu.memory_space<vmem>>, vector<16x32xf32>
    %c0_2 = arith.constant 0 : index
    %c0_3 = arith.constant 0 : index
    %4 = vector.load %arg4[%c0_2, %c0_3] : memref<32x32xf32, #tpu.memory_space<vmem>>, vector<32x32xf32>
    %c0_4 = arith.constant 0 : index
    %c0_5 = arith.constant 0 : index
    %5 = vector.load %arg5[%c0_4, %c0_5] : memref<1x32xf32, #tpu.memory_space<vmem>>, vector<1x32xf32>
    %c0_6 = arith.constant 0 : index
    %c0_7 = arith.constant 0 : index
    %c0_8 = arith.constant 0 : index
    %6 = vector.load %arg2[%c0_6, %c0_7, %c0_8] : memref<8x8x16xf32, #tpu.memory_space<vmem>>, vector<8x8x16xf32>
    %7 = vector.shape_cast %6 : vector<8x8x16xf32> to vector<64x16xf32>
    %cst = arith.constant dense<0.000000e+00> : vector<64x32xf32>
    %8 = tpu.matmul %7, %3, %cst {dimension_numbers = #tpu.dot_dimension_numbers<[1], [0], [0], [1], [0, 0, 1, 1], [], []>} : vector<64x16xf32>, vector<16x32xf32>, vector<64x32xf32> -> vector<64x32xf32>
    %9 = vector.broadcast %5 : vector<1x32xf32> to vector<64x32xf32>
    %10 = arith.addf %8, %9 : vector<64x32xf32>
    %c0_9 = arith.constant 0 : index
    %c0_10 = arith.constant 0 : index
    %c0_11 = arith.constant 0 : index
    %11 = vector.load %arg12[%c0_9, %c0_10, %c0_11] : memref<2x8x32xf32, #tpu.memory_space<vmem>>, vector<1x8x32xf32>
    %12 = vector.shape_cast %11 : vector<1x8x32xf32> to vector<8x32xf32>
    %13 = vector.extract_strided_slice %10 {offsets = [0, 0], sizes = [8, 32], strides = [1, 1]} : vector<64x32xf32> to vector<8x32xf32>
    %cst_12 = arith.constant dense<0.000000e+00> : vector<8x32xf32>
    %14 = tpu.matmul %12, %4, %cst_12 {dimension_numbers = #tpu.dot_dimension_numbers<[1], [0], [0], [1], [0, 0, 1, 1], [], []>} : vector<8x32xf32>, vector<32x32xf32>, vector<8x32xf32> -> vector<8x32xf32>
    %15 = arith.addf %13, %14 : vector<8x32xf32>
    %16 = math.tanh %15 : vector<8x32xf32>
    %c0_13 = arith.constant 0 : index
    %c0_14 = arith.constant 0 : index
    %17 = vector.load %arg13[%c0_13, %c0_14] : memref<64x32xf32, #tpu.memory_space<vmem>>, vector<8x32xf32>
    tpu.vector_store %arg13[%c0_13, %c0_14], %16 {strides = array<i32>} : memref<64x32xf32, #tpu.memory_space<vmem>>, vector<8x32xf32>,
    %18 = vector.extract_strided_slice %10 {offsets = [8, 0], sizes = [8, 32], strides = [1, 1]} : vector<64x32xf32> to vector<8x32xf32>
    %cst_15 = arith.constant dense<0.000000e+00> : vector<8x32xf32>
    %19 = tpu.matmul %16, %4, %cst_15 {dimension_numbers = #tpu.dot_dimension_numbers<[1], [0], [0], [1], [0, 0, 1, 1], [], []>} : vector<8x32xf32>, vector<32x32xf32>, vector<8x32xf32> -> vector<8x32xf32>
    %20 = arith.addf %18, %19 : vector<8x32xf32>
    %21 = math.tanh %20 : vector<8x32xf32>
    %c8 = arith.constant 8 : index
    %c0_16 = arith.constant 0 : index
    %22 = vector.load %arg13[%c8, %c0_16] : memref<64x32xf32, #tpu.memory_space<vmem>>, vector<8x32xf32>
    tpu.vector_store %arg13[%c8, %c0_16], %21 {strides = array<i32>} : memref<64x32xf32, #tpu.memory_space<vmem>>, vector<8x32xf32>,
    %23 = vector.extract_strided_slice %10 {offsets = [16, 0], sizes = [8, 32], strides = [1, 1]} : vector<64x32xf32> to vector<8x32xf32>
    %cst_17 = arith.constant dense<0.000000e+00> : vector<8x32xf32>
    %24 = tpu.matmul %21, %4, %cst_17 {dimension_numbers = #tpu.dot_dimension_numbers<[1], [0], [0], [1], [0, 0, 1, 1], [], []>} : vector<8x32xf32>, vector<32x32xf32>, vector<8x32xf32> -> vector<8x32xf32>
    %25 = arith.addf %23, %24 : vector<8x32xf32>
    %26 = math.tanh %25 : vector<8x32xf32>
    %c16 = arith.constant 16 : index
    %c0_18 = arith.constant 0 : index
    %27 = vector.load %arg13[%c16, %c0_18] : memref<64x32xf32, #tpu.memory_space<vmem>>, vector<8x32xf32>
    tpu.vector_store %arg13[%c16, %c0_18], %26 {strides = array<i32>} : memref<64x32xf32, #tpu.memory_space<vmem>>, vector<8x32xf32>,
    %28 = vector.extract_strided_slice %10 {offsets = [24, 0], sizes = [8, 32], strides = [1, 1]} : vector<64x32xf32> to vector<8x32xf32>
    %cst_19 = arith.constant dense<0.000000e+00> : vector<8x32xf32>
    %29 = tpu.matmul %26, %4, %cst_19 {dimension_numbers = #tpu.dot_dimension_numbers<[1], [0], [0], [1], [0, 0, 1, 1], [], []>} : vector<8x32xf32>, vector<32x32xf32>, vector<8x32xf32> -> vector<8x32xf32>
    %30 = arith.addf %28, %29 : vector<8x32xf32>
    %31 = math.tanh %30 : vector<8x32xf32>
    %c24 = arith.constant 24 : index
    %c0_20 = arith.constant 0 : index
    %32 = vector.load %arg13[%c24, %c0_20] : memref<64x32xf32, #tpu.memory_space<vmem>>, vector<8x32xf32>
    tpu.vector_store %arg13[%c24, %c0_20], %31 {strides = array<i32>} : memref<64x32xf32, #tpu.memory_space<vmem>>, vector<8x32xf32>,
    %33 = vector.extract_strided_slice %10 {offsets = [32, 0], sizes = [8, 32], strides = [1, 1]} : vector<64x32xf32> to vector<8x32xf32>
    %cst_21 = arith.constant dense<0.000000e+00> : vector<8x32xf32>
    %34 = tpu.matmul %31, %4, %cst_21 {dimension_numbers = #tpu.dot_dimension_numbers<[1], [0], [0], [1], [0, 0, 1, 1], [], []>} : vector<8x32xf32>, vector<32x32xf32>, vector<8x32xf32> -> vector<8x32xf32>
    %35 = arith.addf %33, %34 : vector<8x32xf32>
    %36 = math.tanh %35 : vector<8x32xf32>
    %c32 = arith.constant 32 : index
    %c0_22 = arith.constant 0 : index
    %37 = vector.load %arg13[%c32, %c0_22] : memref<64x32xf32, #tpu.memory_space<vmem>>, vector<8x32xf32>
    tpu.vector_store %arg13[%c32, %c0_22], %36 {strides = array<i32>} : memref<64x32xf32, #tpu.memory_space<vmem>>, vector<8x32xf32>,
    %38 = vector.extract_strided_slice %10 {offsets = [40, 0], sizes = [8, 32], strides = [1, 1]} : vector<64x32xf32> to vector<8x32xf32>
    %cst_23 = arith.constant dense<0.000000e+00> : vector<8x32xf32>
    %39 = tpu.matmul %36, %4, %cst_23 {dimension_numbers = #tpu.dot_dimension_numbers<[1], [0], [0], [1], [0, 0, 1, 1], [], []>} : vector<8x32xf32>, vector<32x32xf32>, vector<8x32xf32> -> vector<8x32xf32>
    %40 = arith.addf %38, %39 : vector<8x32xf32>
    %41 = math.tanh %40 : vector<8x32xf32>
    %c40 = arith.constant 40 : index
    %c0_24 = arith.constant 0 : index
    %42 = vector.load %arg13[%c40, %c0_24] : memref<64x32xf32, #tpu.memory_space<vmem>>, vector<8x32xf32>
    tpu.vector_store %arg13[%c40, %c0_24], %41 {strides = array<i32>} : memref<64x32xf32, #tpu.memory_space<vmem>>, vector<8x32xf32>,
    %43 = vector.extract_strided_slice %10 {offsets = [48, 0], sizes = [8, 32], strides = [1, 1]} : vector<64x32xf32> to vector<8x32xf32>
    %cst_25 = arith.constant dense<0.000000e+00> : vector<8x32xf32>
    %44 = tpu.matmul %41, %4, %cst_25 {dimension_numbers = #tpu.dot_dimension_numbers<[1], [0], [0], [1], [0, 0, 1, 1], [], []>} : vector<8x32xf32>, vector<32x32xf32>, vector<8x32xf32> -> vector<8x32xf32>
    %45 = arith.addf %43, %44 : vector<8x32xf32>
    %46 = math.tanh %45 : vector<8x32xf32>
    %c48 = arith.constant 48 : index
    %c0_26 = arith.constant 0 : index
    %47 = vector.load %arg13[%c48, %c0_26] : memref<64x32xf32, #tpu.memory_space<vmem>>, vector<8x32xf32>
    tpu.vector_store %arg13[%c48, %c0_26], %46 {strides = array<i32>} : memref<64x32xf32, #tpu.memory_space<vmem>>, vector<8x32xf32>,
    %48 = vector.extract_strided_slice %10 {offsets = [56, 0], sizes = [8, 32], strides = [1, 1]} : vector<64x32xf32> to vector<8x32xf32>
    %cst_27 = arith.constant dense<0.000000e+00> : vector<8x32xf32>
    %49 = tpu.matmul %46, %4, %cst_27 {dimension_numbers = #tpu.dot_dimension_numbers<[1], [0], [0], [1], [0, 0, 1, 1], [], []>} : vector<8x32xf32>, vector<32x32xf32>, vector<8x32xf32> -> vector<8x32xf32>
    %50 = arith.addf %48, %49 : vector<8x32xf32>
    %51 = math.tanh %50 : vector<8x32xf32>
    %c56 = arith.constant 56 : index
    %c0_28 = arith.constant 0 : index
    %52 = vector.load %arg13[%c56, %c0_28] : memref<64x32xf32, #tpu.memory_space<vmem>>, vector<8x32xf32>
    tpu.vector_store %arg13[%c56, %c0_28], %51 {strides = array<i32>} : memref<64x32xf32, #tpu.memory_space<vmem>>, vector<8x32xf32>,
    %c0_29 = arith.constant 0 : index
    %c0_30 = arith.constant 0 : index
    %c0_31 = arith.constant 0 : index
    %53 = vector.load %arg12[%c0_29, %c0_30, %c0_31] : memref<2x8x32xf32, #tpu.memory_space<vmem>>, vector<1x8x32xf32>
    %54 = vector.shape_cast %53 : vector<1x8x32xf32> to vector<8x32xf32>
    %55 = vector.shape_cast %51 : vector<8x32xf32> to vector<1x8x32xf32>
    tpu.vector_store %arg12[%c0_29, %c0_30, %c0_31], %55 {strides = array<i32>} : memref<2x8x32xf32, #tpu.memory_space<vmem>>, vector<1x8x32xf32>,
    %c0_32 = arith.constant 0 : index
    %c0_33 = arith.constant 0 : index
    %56 = vector.load %arg6[%c0_32, %c0_33] : memref<32x32xf32, #tpu.memory_space<vmem>>, vector<32x32xf32>
    %c0_34 = arith.constant 0 : index
    %c0_35 = arith.constant 0 : index
    %57 = vector.load %arg7[%c0_34, %c0_35] : memref<32x32xf32, #tpu.memory_space<vmem>>, vector<32x32xf32>
    %c0_36 = arith.constant 0 : index
    %c0_37 = arith.constant 0 : index
    %58 = vector.load %arg8[%c0_36, %c0_37] : memref<1x32xf32, #tpu.memory_space<vmem>>, vector<1x32xf32>
    %c0_38 = arith.constant 0 : index
    %c0_39 = arith.constant 0 : index
    %59 = vector.load %arg13[%c0_38, %c0_39] : memref<64x32xf32, #tpu.memory_space<vmem>>, vector<64x32xf32>
    %cst_40 = arith.constant dense<0.000000e+00> : vector<64x32xf32>
    %60 = tpu.matmul %59, %56, %cst_40 {dimension_numbers = #tpu.dot_dimension_numbers<[1], [0], [0], [1], [0, 0, 1, 1], [], []>} : vector<64x32xf32>, vector<32x32xf32>, vector<64x32xf32> -> vector<64x32xf32>
    %61 = vector.broadcast %58 : vector<1x32xf32> to vector<64x32xf32>
    %62 = arith.addf %60, %61 : vector<64x32xf32>
    %c1 = arith.constant 1 : index
    %c0_41 = arith.constant 0 : index
    %c0_42 = arith.constant 0 : index
    %63 = vector.load %arg12[%c1, %c0_41, %c0_42] : memref<2x8x32xf32, #tpu.memory_space<vmem>>, vector<1x8x32xf32>
    %64 = vector.shape_cast %63 : vector<1x8x32xf32> to vector<8x32xf32>
    %65 = vector.extract_strided_slice %62 {offsets = [0, 0], sizes = [8, 32], strides = [1, 1]} : vector<64x32xf32> to vector<8x32xf32>
    %cst_43 = arith.constant dense<0.000000e+00> : vector<8x32xf32>
    %66 = tpu.matmul %64, %57, %cst_43 {dimension_numbers = #tpu.dot_dimension_numbers<[1], [0], [0], [1], [0, 0, 1, 1], [], []>} : vector<8x32xf32>, vector<32x32xf32>, vector<8x32xf32> -> vector<8x32xf32>
    %67 = arith.addf %65, %66 : vector<8x32xf32>
    %68 = math.tanh %67 : vector<8x32xf32>
    %c0_44 = arith.constant 0 : index
    %c0_45 = arith.constant 0 : index
    %69 = vector.load %arg13[%c0_44, %c0_45] : memref<64x32xf32, #tpu.memory_space<vmem>>, vector<8x32xf32>
    tpu.vector_store %arg13[%c0_44, %c0_45], %68 {strides = array<i32>} : memref<64x32xf32, #tpu.memory_space<vmem>>, vector<8x32xf32>,
    %70 = vector.extract_strided_slice %62 {offsets = [8, 0], sizes = [8, 32], strides = [1, 1]} : vector<64x32xf32> to vector<8x32xf32>
    %cst_46 = arith.constant dense<0.000000e+00> : vector<8x32xf32>
    %71 = tpu.matmul %68, %57, %cst_46 {dimension_numbers = #tpu.dot_dimension_numbers<[1], [0], [0], [1], [0, 0, 1, 1], [], []>} : vector<8x32xf32>, vector<32x32xf32>, vector<8x32xf32> -> vector<8x32xf32>
    %72 = arith.addf %70, %71 : vector<8x32xf32>
    %73 = math.tanh %72 : vector<8x32xf32>
    %c8_47 = arith.constant 8 : index
    %c0_48 = arith.constant 0 : index
    %74 = vector.load %arg13[%c8_47, %c0_48] : memref<64x32xf32, #tpu.memory_space<vmem>>, vector<8x32xf32>
    tpu.vector_store %arg13[%c8_47, %c0_48], %73 {strides = array<i32>} : memref<64x32xf32, #tpu.memory_space<vmem>>, vector<8x32xf32>,
    %75 = vector.extract_strided_slice %62 {offsets = [16, 0], sizes = [8, 32], strides = [1, 1]} : vector<64x32xf32> to vector<8x32xf32>
    %cst_49 = arith.constant dense<0.000000e+00> : vector<8x32xf32>
    %76 = tpu.matmul %73, %57, %cst_49 {dimension_numbers = #tpu.dot_dimension_numbers<[1], [0], [0], [1], [0, 0, 1, 1], [], []>} : vector<8x32xf32>, vector<32x32xf32>, vector<8x32xf32> -> vector<8x32xf32>
    %77 = arith.addf %75, %76 : vector<8x32xf32>
    %78 = math.tanh %77 : vector<8x32xf32>
    %c16_50 = arith.constant 16 : index
    %c0_51 = arith.constant 0 : index
    %79 = vector.load %arg13[%c16_50, %c0_51] : memref<64x32xf32, #tpu.memory_space<vmem>>, vector<8x32xf32>
    tpu.vector_store %arg13[%c16_50, %c0_51], %78 {strides = array<i32>} : memref<64x32xf32, #tpu.memory_space<vmem>>, vector<8x32xf32>,
    %80 = vector.extract_strided_slice %62 {offsets = [24, 0], sizes = [8, 32], strides = [1, 1]} : vector<64x32xf32> to vector<8x32xf32>
    %cst_52 = arith.constant dense<0.000000e+00> : vector<8x32xf32>
    %81 = tpu.matmul %78, %57, %cst_52 {dimension_numbers = #tpu.dot_dimension_numbers<[1], [0], [0], [1], [0, 0, 1, 1], [], []>} : vector<8x32xf32>, vector<32x32xf32>, vector<8x32xf32> -> vector<8x32xf32>
    %82 = arith.addf %80, %81 : vector<8x32xf32>
    %83 = math.tanh %82 : vector<8x32xf32>
    %c24_53 = arith.constant 24 : index
    %c0_54 = arith.constant 0 : index
    %84 = vector.load %arg13[%c24_53, %c0_54] : memref<64x32xf32, #tpu.memory_space<vmem>>, vector<8x32xf32>
    tpu.vector_store %arg13[%c24_53, %c0_54], %83 {strides = array<i32>} : memref<64x32xf32, #tpu.memory_space<vmem>>, vector<8x32xf32>,
    %85 = vector.extract_strided_slice %62 {offsets = [32, 0], sizes = [8, 32], strides = [1, 1]} : vector<64x32xf32> to vector<8x32xf32>
    %cst_55 = arith.constant dense<0.000000e+00> : vector<8x32xf32>
    %86 = tpu.matmul %83, %57, %cst_55 {dimension_numbers = #tpu.dot_dimension_numbers<[1], [0], [0], [1], [0, 0, 1, 1], [], []>} : vector<8x32xf32>, vector<32x32xf32>, vector<8x32xf32> -> vector<8x32xf32>
    %87 = arith.addf %85, %86 : vector<8x32xf32>
    %88 = math.tanh %87 : vector<8x32xf32>
    %c32_56 = arith.constant 32 : index
    %c0_57 = arith.constant 0 : index
    %89 = vector.load %arg13[%c32_56, %c0_57] : memref<64x32xf32, #tpu.memory_space<vmem>>, vector<8x32xf32>
    tpu.vector_store %arg13[%c32_56, %c0_57], %88 {strides = array<i32>} : memref<64x32xf32, #tpu.memory_space<vmem>>, vector<8x32xf32>,
    %90 = vector.extract_strided_slice %62 {offsets = [40, 0], sizes = [8, 32], strides = [1, 1]} : vector<64x32xf32> to vector<8x32xf32>
    %cst_58 = arith.constant dense<0.000000e+00> : vector<8x32xf32>
    %91 = tpu.matmul %88, %57, %cst_58 {dimension_numbers = #tpu.dot_dimension_numbers<[1], [0], [0], [1], [0, 0, 1, 1], [], []>} : vector<8x32xf32>, vector<32x32xf32>, vector<8x32xf32> -> vector<8x32xf32>
    %92 = arith.addf %90, %91 : vector<8x32xf32>
    %93 = math.tanh %92 : vector<8x32xf32>
    %c40_59 = arith.constant 40 : index
    %c0_60 = arith.constant 0 : index
    %94 = vector.load %arg13[%c40_59, %c0_60] : memref<64x32xf32, #tpu.memory_space<vmem>>, vector<8x32xf32>
    tpu.vector_store %arg13[%c40_59, %c0_60], %93 {strides = array<i32>} : memref<64x32xf32, #tpu.memory_space<vmem>>, vector<8x32xf32>,
    %95 = vector.extract_strided_slice %62 {offsets = [48, 0], sizes = [8, 32], strides = [1, 1]} : vector<64x32xf32> to vector<8x32xf32>
    %cst_61 = arith.constant dense<0.000000e+00> : vector<8x32xf32>
    %96 = tpu.matmul %93, %57, %cst_61 {dimension_numbers = #tpu.dot_dimension_numbers<[1], [0], [0], [1], [0, 0, 1, 1], [], []>} : vector<8x32xf32>, vector<32x32xf32>, vector<8x32xf32> -> vector<8x32xf32>
    %97 = arith.addf %95, %96 : vector<8x32xf32>
    %98 = math.tanh %97 : vector<8x32xf32>
    %c48_62 = arith.constant 48 : index
    %c0_63 = arith.constant 0 : index
    %99 = vector.load %arg13[%c48_62, %c0_63] : memref<64x32xf32, #tpu.memory_space<vmem>>, vector<8x32xf32>
    tpu.vector_store %arg13[%c48_62, %c0_63], %98 {strides = array<i32>} : memref<64x32xf32, #tpu.memory_space<vmem>>, vector<8x32xf32>,
    %100 = vector.extract_strided_slice %62 {offsets = [56, 0], sizes = [8, 32], strides = [1, 1]} : vector<64x32xf32> to vector<8x32xf32>
    %cst_64 = arith.constant dense<0.000000e+00> : vector<8x32xf32>
    %101 = tpu.matmul %98, %57, %cst_64 {dimension_numbers = #tpu.dot_dimension_numbers<[1], [0], [0], [1], [0, 0, 1, 1], [], []>} : vector<8x32xf32>, vector<32x32xf32>, vector<8x32xf32> -> vector<8x32xf32>
    %102 = arith.addf %100, %101 : vector<8x32xf32>
    %103 = math.tanh %102 : vector<8x32xf32>
    %c56_65 = arith.constant 56 : index
    %c0_66 = arith.constant 0 : index
    %104 = vector.load %arg13[%c56_65, %c0_66] : memref<64x32xf32, #tpu.memory_space<vmem>>, vector<8x32xf32>
    tpu.vector_store %arg13[%c56_65, %c0_66], %103 {strides = array<i32>} : memref<64x32xf32, #tpu.memory_space<vmem>>, vector<8x32xf32>,
    %c1_67 = arith.constant 1 : index
    %c0_68 = arith.constant 0 : index
    %c0_69 = arith.constant 0 : index
    %105 = vector.load %arg12[%c1_67, %c0_68, %c0_69] : memref<2x8x32xf32, #tpu.memory_space<vmem>>, vector<1x8x32xf32>
    %106 = vector.shape_cast %105 : vector<1x8x32xf32> to vector<8x32xf32>
    %107 = vector.shape_cast %103 : vector<8x32xf32> to vector<1x8x32xf32>
    tpu.vector_store %arg12[%c1_67, %c0_68, %c0_69], %107 {strides = array<i32>} : memref<2x8x32xf32, #tpu.memory_space<vmem>>, vector<1x8x32xf32>,
    %c0_70 = arith.constant 0 : index
    %c0_71 = arith.constant 0 : index
    %108 = vector.load %arg13[%c0_70, %c0_71] : memref<64x32xf32, #tpu.memory_space<vmem>>, vector<64x32xf32>
    %c0_72 = arith.constant 0 : index
    %c0_73 = arith.constant 0 : index
    %109 = vector.load %arg9[%c0_72, %c0_73] : memref<32x16xf32, #tpu.memory_space<vmem>>, vector<32x16xf32>
    %cst_74 = arith.constant dense<0.000000e+00> : vector<64x16xf32>
    %110 = tpu.matmul %108, %109, %cst_74 {dimension_numbers = #tpu.dot_dimension_numbers<[1], [0], [0], [1], [0, 0, 1, 1], [], []>} : vector<64x32xf32>, vector<32x16xf32>, vector<64x16xf32> -> vector<64x16xf32>
    %c0_75 = arith.constant 0 : index
    %c0_76 = arith.constant 0 : index
    %111 = vector.load %arg10[%c0_75, %c0_76] : memref<1x16xf32, #tpu.memory_space<vmem>>, vector<1x16xf32>
    %112 = vector.broadcast %111 : vector<1x16xf32> to vector<64x16xf32>
    %113 = arith.addf %110, %112 : vector<64x16xf32>
    %114 = vector.shape_cast %113 : vector<64x16xf32> to vector<8x8x16xf32>
    %c0_77 = arith.constant 0 : index
    %c0_78 = arith.constant 0 : index
    %c0_79 = arith.constant 0 : index
    %115 = vector.load %arg11[%c0_77, %c0_78, %c0_79] : memref<8x8x16xf32, #tpu.memory_space<vmem>>, vector<8x8x16xf32>
    tpu.vector_store %arg11[%c0_77, %c0_78, %c0_79], %114 {strides = array<i32>} : memref<8x8x16xf32, #tpu.memory_space<vmem>>, vector<8x8x16xf32>,
    return
  }
  func.func @transform_0(%arg0: i32, %arg1: i32) -> (i32, i32, i32) {
    %c0_i32 = arith.constant 0 : i32
    %c0_i32_0 = arith.constant 0 : i32
    return %arg1, %arg0, %c0_i32 : i32, i32, i32
  }
  func.func @transform_1(%arg0: i32, %arg1: i32) -> (i32, i32) {
    %c0_i32 = arith.constant 0 : i32
    %c0_i32_0 = arith.constant 0 : i32
    %c0_i32_1 = arith.constant 0 : i32
    return %c0_i32, %c0_i32_0 : i32, i32
  }
  func.func @transform_2(%arg0: i32, %arg1: i32) -> (i32, i32) {
    %c0_i32 = arith.constant 0 : i32
    %c0_i32_0 = arith.constant 0 : i32
    %c0_i32_1 = arith.constant 0 : i32
    return %c0_i32, %c0_i32_0 : i32, i32
  }
  func.func @transform_3(%arg0: i32, %arg1: i32) -> (i32, i32) {
    %c0_i32 = arith.constant 0 : i32
    %c0_i32_0 = arith.constant 0 : i32
    %c0_i32_1 = arith.constant 0 : i32
    return %c0_i32, %c0_i32_0 : i32, i32
  }
  func.func @transform_4(%arg0: i32, %arg1: i32) -> (i32, i32) {
    %c0_i32 = arith.constant 0 : i32
    %c0_i32_0 = arith.constant 0 : i32
    %c0_i32_1 = arith.constant 0 : i32
    return %c0_i32, %c0_i32_0 : i32, i32
  }
  func.func @transform_5(%arg0: i32, %arg1: i32) -> (i32, i32) {
    %c0_i32 = arith.constant 0 : i32
    %c0_i32_0 = arith.constant 0 : i32
    %c0_i32_1 = arith.constant 0 : i32
    return %c0_i32, %c0_i32_0 : i32, i32
  }
  func.func @transform_6(%arg0: i32, %arg1: i32) -> (i32, i32) {
    %c0_i32 = arith.constant 0 : i32
    %c0_i32_0 = arith.constant 0 : i32
    %c0_i32_1 = arith.constant 0 : i32
    return %c0_i32, %c0_i32_0 : i32, i32
  }
  func.func @transform_7(%arg0: i32, %arg1: i32) -> (i32, i32) {
    %c0_i32 = arith.constant 0 : i32
    %c0_i32_0 = arith.constant 0 : i32
    %c0_i32_1 = arith.constant 0 : i32
    return %c0_i32, %c0_i32_0 : i32, i32
  }
  func.func @transform_8(%arg0: i32, %arg1: i32) -> (i32, i32) {
    %c0_i32 = arith.constant 0 : i32
    %c0_i32_0 = arith.constant 0 : i32
    %c0_i32_1 = arith.constant 0 : i32
    return %c0_i32, %c0_i32_0 : i32, i32
  }
  func.func @transform_9(%arg0: i32, %arg1: i32) -> (i32, i32, i32) {
    %c0_i32 = arith.constant 0 : i32
    %c0_i32_0 = arith.constant 0 : i32
    return %arg1, %arg0, %c0_i32 : i32, i32, i32
  }
  func.func @transform_10(%arg0: i32, %arg1: i32) -> (i32, i32, i32) {
    %c0_i32 = arith.constant 0 : i32
    %c0_i32_0 = arith.constant 0 : i32
    %c0_i32_1 = arith.constant 0 : i32
    return %c0_i32, %arg0, %c0_i32_0 : i32, i32, i32
  }
}

</mosaic_0001>

<bundles_post_ra>
// kernel: rnn_forward.1
= control target key start
LH: loop header
LB: loop body
LE: loop exit
PB: predicated region body
PF: predicated region fallthrough
CT: control target
= control target key end

     0   :  { %vm63_vm0 = vcmask 130048   ;;  %vm39_vm1 = vcmask 261120   ;;  %v2312_v7 = vmov 0.0   ;;  %s2717_s0 = inlined_call_operand.vmem [shape: f32[8,8,16], index: 0, kind: input, shape index: {}]   ;;  %s2718_s1 = inlined_call_operand.vmem [shape: f32[16,32], index: 1, kind: input, shape index: {}]   ;;  %s2719_s2 = inlined_call_operand.vmem [shape: f32[32,32], index: 2, kind: input, shape index: {}]   ;;  %s2720_s3 = inlined_call_operand.vmem [shape: f32[1,32], index: 3, kind: input, shape index: {}]   ;;  %s2721_s4 = inlined_call_operand.vmem [shape: f32[32,32], index: 4, kind: input, shape index: {}]   ;;  %s2722_s5 = inlined_call_operand.vmem [shape: f32[32,32], index: 5, kind: input, shape index: {}]   ;;  %s2723_s6 = inlined_call_operand.vmem [shape: f32[1,32], index: 6, kind: input, shape index: {}]   ;;  %s2724_s7 = inlined_call_operand.vmem [shape: f32[32,16], index: 7, kind: input, shape index: {}]   ;;  %s2725_s8 = inlined_call_operand.vmem [shape: f32[1,16], index: 8, kind: input, shape index: {}]   ;;  %s2726_s9 = inlined_call_operand.vmem [shape: f32[8,8,16], index: 9, kind: output, shape index: {0}]   ;;  %s2727_s10 = inlined_call_operand.hbm [shape: f32[2,8,32], index: 10, kind: output, shape index: {1}]  }
   0x1   :  { %v42_v0 = vld [vmem:[%s2718_s1] sm:$0xff]  ;;  %v43_v1 = vld [vmem:[%s2718_s1 + $0x8] sm:$0xff]  ;;  %40 = vst.msk [vmem:[#allocation3] sm:$0xff] %vm39_vm1, %v2312_v7  ;;  %41 = vst.msk [vmem:[#allocation3 + $0x8] sm:$0xff] %vm39_vm1, %v2312_v7 }
   0x2   :  { %v53_v2 = vld [vmem:[%s2717_s0 + $0x20] sm:$0xff]  ;;  %v2132_v3 = vpack.c.bf16 %v43_v1, %v42_v0  ;;  %v45_v5 = vld [vmem:[%s2719_s2 + $0x8] sm:$0xff] }
   0x3   :  { %1910 = vmatprep.mubr.msk.f32.mxu1 %vm63_vm0, %v53_v2  ;;  %v44_v4 = vld [vmem:[%s2719_s2] sm:$0xff]  ;;  %v54_v8 = vld [vmem:[%s2717_s0 + $0x28] sm:$0xff] }
   0x4   :  { %v49_v6 = vld [vmem:[%s2717_s0] sm:$0xff]  ;;  %2248 = vmatprep.subr.bf16.mxu1 %v2132_v3  ;;  %2133 = vmatprep.subr.bf16.mxu0 %v2132_v3  ;;  %v2399_v9 = vpack.c.bf16 %v45_v5, %v44_v4  ;;  %v50_v10 = vld [vmem:[%s2717_s0 + $0x8] sm:$0xff] }
   0x5   :  { %2249 = vmatpush3.bf16.msra.mxu1 %v2132_v3  ;;  %2135 = vmatpush3.bf16.msra.mxu0 %v2132_v3 }
   0x6   :  { %16 = vsyncpa [#allocation4], 0  ;;  %v2313_v11 = vmov 0.0|0.0   ;;  %v55_v12 = vld [vmem:[%s2717_s0 + $0x30] sm:$0xff]  ;;  %1904 = vmatprep.mubr.msk.f32.mxu0 %vm63_vm0, %v49_v6  ;;  %v47_v14 = vld [vmem:[%s2719_s2 + $0x18] sm:$0xff]  ;;  %vm2314_vm2 = vmmov 0  }
   0x7   :  { %2136 = vmatprep.subr.bf16.mxu1 %v2313_v11  ;;  %v46_v13 = vld [vmem:[%s2719_s2 + $0x10] sm:$0xff]  ;;  %2148 = vmatprep.subr.bf16.mxu0 %v2313_v11  ;;  %v56_v15 = vld [vmem:[%s2717_s0 + $0x38] sm:$0xff]  ;;  %v2449_v22 = vld [vmem:[%s2720_s3] ss:$0 sm:$0xff]  ;;  %s2315_s28 = smov [#allocation3]  }
   0x8   :  { %1911 = vmatmul.mubr.msk.f32.vlgmr.msra.gmra.mrb[0].mxu1 %vm63_vm0, %v54_v8  ;;  %1905 = vmatmul.mubr.msk.f32.vlgmr.msra.gmra.mrb[0].mxu0 %vm63_vm0, %v50_v10  ;;  %v2423_v16 = vpack.c.bf16 %v47_v14, %v46_v13  ;;  %v193_v17 = vld [vmem:[#allocation3] sm:$0xff]  ;;  %v51_v30 = vld [vmem:[%s2717_s0 + $0x10] sm:$0xff]  ;;  %v52_v31 = vld [vmem:[%s2717_s0 + $0x18] sm:$0xff]  ;;  %s1730_s29 = sshll.u32 %s2315_s28, 4  ;;  %s1731_s29 = int_to_ptr.vmem [resolvable:$true] %s1730_s29 }
   0x9   :  { %2138 = vmatpush3.bf16.msra.mxu1 %v2399_v9  ;;  %1913 = vmatprep.mubr.msk.f32.mxu1 %vm63_vm0, %v55_v12  ;;  %v804_v54 = vld [vmem:[%s2721_s4] sm:$0xff]  ;;  %v805_v55 = vld [vmem:[%s2721_s4 + $0x8] sm:$0xff]  ;;  %v806_v61 = vld [vmem:[%s2721_s4 + $0x10] sm:$0xff]  ;;  %s2288_s30 = scalar_lea.vmem %s1731_s29, 256  ;;  %p2293_p1 = scmp.lt.s32.totalorder %s1731_s29, %s1731_s29 }
   0xa   :  { %2139 = vmatprep.subr.bf16.mxu1 %v2313_v11  ;;  %2150 = vmatpush3.bf16.msra.mxu0 %v2399_v9  ;;  %v2184_v56 = vpack.c.bf16 %v805_v55, %v804_v54  ;;  %v807_v62 = vld [vmem:[%s2721_s4 + $0x18] sm:$0xff]  ;;  %v808_v8 = vld [vmem:[%s2722_s5] sm:$0xff]  ;;  %v810_v12 = vld [vmem:[%s2722_s5 + $0x10] sm:$0xff]  ;;  %p2289_p0 = scmp.ne.s32.totalorder %s1731_s29, %s2288_s30  ;;  %p2294_p2 = scmp.lt.s32.totalorder %s2288_s30, %s2288_s30 }
   0xb   :  { %2151 = vmatprep.subr.bf16.mxu0 %v2313_v11  ;;  %1907 = vmatprep.mubr.msk.f32.mxu0 %vm63_vm0, %v51_v30  ;;  %v2188_v63 = vpack.c.bf16 %v807_v62, %v806_v61  ;;  %v811_v13 = vld [vmem:[%s2722_s5 + $0x18] sm:$0xff]  ;;  %v1575_v62 = vld [vmem:[%s2724_s7] sm:$0xff] }
   0xc   :  { %1914 = vmatmul.mubr.msk.f32.gmra.mrb[2].mxu1 %vm63_vm0, %v56_v15  ;;  %1908 = vmatmul.mubr.msk.f32.gmra.mrb[2].mxu0 %vm63_vm0, %v52_v31  ;;  %v2549_v14 = vpack.c.bf16 %v811_v13, %v810_v12  ;;  %p2295_p3 = por %p2294_p2, %p2293_p1 }
   0xd   :  { %2141 = vmatpush3.bf16.msra.mxu1 %v2423_v16  ;;  %1924 = vmatprep.mubr.msk.f32.mxu1 %vm2314_vm2, %v2312_v7 }
   0xe   :  { %2142 = vmatprep.subr.bf16.mxu1 %v2313_v11  ;;  %2153 = vmatpush3.bf16.msra.mxu0 %v2423_v16  ;;  %p2296_p4 = pnand %p2295_p3, %p2289_p0 }
   0xf   :  { %2160 = vmatprep.subr.bf16.mxu0 %v2313_v11  ;;  %1946 = vmatprep.mubr.msk.f32.mxu0 %vm2314_vm2, %v2312_v7 }
  0x10   :  { %1925 = vmatmul.mubr.msk.f32.vlgmr.msra.gmra.mrb[4].mxu1 %vm39_vm1, %v193_v17 }
  0x11   :  { %2144 = vmatpush3.bf16.msra.mxu1 %v2399_v9  ;;  %1935 = vmatprep.mubr.msk.f32.mxu1 %vm2314_vm2, %v2312_v7 }
  0x12   :  { %2145 = vmatprep.subr.bf16.mxu1 %v2313_v11 }
  0x15   :  { %2147 = vmatpush3.bf16.msra.mxu1 %v2423_v16 }
  0x16   :  { %2154 = vmatprep.subr.bf16.mxu1 %v2313_v11 }
  0xdb   :  { %v2442_v18 = vpop.f32.mrb[0].mxu1  ;;  %v1906_v19 = vpop.f32.mrb[0].mxu0 }
  0xdc   :  { %v2444_v20 = vpop.f32.mrb[1].mxu1  ;;  %v154_v21 = vpop.f32.mrb[1].mxu0  ;;  %v160_v32 = vadd.f32 %v1906_v19, %v2449_v22  ;;  %v180_v57 = vadd.f32 %v2442_v18, %v2449_v22 }
  0xdd   :  { %v155_v25 = vadd.f32 %v2449_v22, %v154_v21  ;;  %v175_v49 = vadd.f32 %v2449_v22, %v2444_v20 }
  0xdf   :  { %v2451_v23 = vpop.f32.mrb[2].mxu1  ;;  %v1909_v37 = vpop.f32.mrb[2].mxu0 }
  0xe0   :  { %v2453_v24 = vpop.f32.mrb[3].mxu1  ;;  %v164_v38 = vpop.f32.mrb[3].mxu0  ;;  %v170_v44 = vadd.f32 %v1909_v37, %v2449_v22  ;;  %v190_v30 = vadd.f32 %v2451_v23, %v2449_v22 }
  0xe1   :  { %v165_v39 = vadd.f32 %v2449_v22, %v164_v38  ;;  %v185_v15 = vadd.f32 %v2449_v22, %v2453_v24 }
  0xe3   :  { %v264_v26 = vpop.f32.mrb[4].mxu1 }
  0xe4   :  { %v268_v27 = vadd.f32 %v264_v26, %v155_v25  ;;  %v1926_v28 = vpop.f32.mrb[5].mxu1 }
  0xe5   :  { %v957_v28 = vld [vmem:[#allocation3 + $0x8] sm:$0xff] }
  0xe6   :  { %2256 = vtanh.f32 %v268_v27 }
  0xf0   :  { %v2257_v29 = vpop.eup %2256 }
  0xf1   :  { %270 = vst.msk [vmem:[#allocation2] sm:$0xff] %vm39_vm1, %v2257_v29  ;;  %1936 = vmatmul.mubr.msk.f32.vlgmr.msra.gmra.mrb[6].mxu1 %vm39_vm1, %v2257_v29 }
  0xf2   :  { %2156 = vmatpush3.bf16.msra.mxu1 %v2399_v9  ;;  %1957 = vmatprep.mubr.msk.f32.mxu1 %vm2314_vm2, %v2312_v7 }
  0xf3   :  { %2157 = vmatprep.subr.bf16.mxu1 %v2313_v11 }
  0xf6   :  { %2159 = vmatpush3.bf16.msra.mxu1 %v2423_v16 }
  0xf7   :  { %2166 = vmatprep.subr.bf16.mxu1 %v2313_v11 }
  0xf8   :  { %v813_v1 = vld [vmem:[#allocation2] sm:$0xff] }
 0x1c4   :  { %v340_v33 = vpop.f32.mrb[6].mxu1 }
 0x1c5   :  { %v344_v34 = vadd.f32 %v340_v33, %v160_v32  ;;  %v1937_v35 = vpop.f32.mrb[7].mxu1 }
 0x1c7   :  { %2258 = vtanh.f32 %v344_v34  ;;  %v2582_v34 = vld [vmem:[%s2723_s6] ss:$0 sm:$0xff] }
 0x1d1   :  { %v2259_v36 = vpop.eup %2258 }
 0x1d2   :  { %346 = vst.msk [vmem:[#allocation2 + $0x8] sm:$0xff] %vm39_vm1, %v2259_v36  ;;  %1947 = vmatmul.mubr.msk.f32.vlgmr.msra.gmra.mrb[4].mxu0 %vm39_vm1, %v2259_v36 }
 0x1d3   :  { %2162 = vmatpush3.bf16.msra.mxu0 %v2399_v9  ;;  %1968 = vmatprep.mubr.msk.f32.mxu0 %vm2314_vm2, %v2312_v7 }
 0x1d4   :  { %2163 = vmatprep.subr.bf16.mxu0 %v2313_v11 }
 0x1d7   :  { %2165 = vmatpush3.bf16.msra.mxu0 %v2423_v16 }
 0x1d8   :  { %2172 = vmatprep.subr.bf16.mxu0 %v2313_v11 }
 0x1d9   :  { %v814_v2 = vld [vmem:[#allocation2 + $0x8] sm:$0xff] }
 0x2a5   :  { %v416_v40 = vpop.f32.mrb[4].mxu0 }
 0x2a6   :  { %v420_v41 = vadd.f32 %v416_v40, %v165_v39  ;;  %v1948_v42 = vpop.f32.mrb[5].mxu0 }
 0x2a8   :  { %2260 = vtanh.f32 %v420_v41 }
 0x2b2   :  { %v2261_v43 = vpop.eup %2260 }
 0x2b3   :  { %422 = vst.msk [vmem:[#allocation2 + $0x10] sm:$0xff] %vm39_vm1, %v2261_v43  ;;  %1958 = vmatmul.mubr.msk.f32.vlgmr.msra.gmra.mrb[8].mxu1 %vm39_vm1, %v2261_v43 }
 0x2b4   :  { %2168 = vmatpush3.bf16.msra.mxu1 %v2399_v9  ;;  %1979 = vmatprep.mubr.msk.f32.mxu1 %vm2314_vm2, %v2312_v7 }
 0x2b5   :  { %2169 = vmatprep.subr.bf16.mxu1 %v2313_v11 }
 0x2b8   :  { %2171 = vmatpush3.bf16.msra.mxu1 %v2423_v16 }
 0x2b9   :  { %2178 = vmatprep.subr.bf16.mxu1 %v2313_v11 }
 0x2ba   :  { %v815_v3 = vld [vmem:[#allocation2 + $0x10] sm:$0xff] }
 0x386   :  { %v492_v45 = vpop.f32.mrb[8].mxu1 }
 0x387   :  { %v496_v46 = vadd.f32 %v492_v45, %v170_v44  ;;  %v1959_v47 = vpop.f32.mrb[9].mxu1 }
 0x389   :  { %2262 = vtanh.f32 %v496_v46 }
 0x393   :  { %v2263_v48 = vpop.eup %2262 }
 0x394   :  { %498 = vst.msk [vmem:[#allocation2 + $0x18] sm:$0xff] %vm39_vm1, %v2263_v48  ;;  %1969 = vmatmul.mubr.msk.f32.vlgmr.msra.gmra.mrb[6].mxu0 %vm39_vm1, %v2263_v48 }
 0x395   :  { %2174 = vmatpush3.bf16.msra.mxu0 %v2399_v9  ;;  %1990 = vmatprep.mubr.msk.f32.mxu0 %vm2314_vm2, %v2312_v7 }
 0x396   :  { %2175 = vmatprep.subr.bf16.mxu0 %v2313_v11 }
 0x399   :  { %2177 = vmatpush3.bf16.msra.mxu0 %v2423_v16 }
 0x39a   :  { %2185 = vmatprep.subr.bf16.mxu0 %v2184_v56 }
 0x39b   :  { %v816_v4 = vld [vmem:[#allocation2 + $0x18] sm:$0xff] }
 0x467   :  { %v568_v50 = vpop.f32.mrb[6].mxu0 }
 0x468   :  { %v572_v51 = vadd.f32 %v568_v50, %v175_v49  ;;  %v1970_v52 = vpop.f32.mrb[7].mxu0 }
 0x46a   :  { %2264 = vtanh.f32 %v572_v51 }
 0x474   :  { %v2265_v53 = vpop.eup %2264 }
 0x475   :  { %574 = vst.msk [vmem:[#allocation2 + $0x20] sm:$0xff] %vm39_vm1, %v2265_v53  ;;  %1980 = vmatmul.mubr.msk.f32.vlgmr.msra.gmra.mrb[10].mxu1 %vm39_vm1, %v2265_v53 }
 0x476   :  { %2180 = vmatpush3.bf16.msra.mxu1 %v2399_v9  ;;  %2001 = vmatprep.mubr.msk.f32.mxu1 %vm2314_vm2, %v2312_v7  ;;  %v809_v9 = vld [vmem:[%s2722_s5 + $0x8] sm:$0xff] }
 0x477   :  { %2181 = vmatprep.subr.bf16.mxu1 %v2313_v11  ;;  %v2539_v10 = vpack.c.bf16 %v809_v9, %v808_v8 }
 0x47a   :  { %2183 = vmatpush3.bf16.msra.mxu1 %v2423_v16 }
 0x47b   :  { %2192 = vmatprep.subr.bf16.mxu1 %v2313_v11 }
 0x47c   :  { %v817_v5 = vld [vmem:[#allocation2 + $0x20] sm:$0xff] }
 0x548   :  { %v644_v58 = vpop.f32.mrb[10].mxu1 }
 0x549   :  { %v648_v59 = vadd.f32 %v644_v58, %v180_v57  ;;  %v1981_v60 = vpop.f32.mrb[11].mxu1 }
 0x54b   :  { %2266 = vtanh.f32 %v648_v59 }
 0x555   :  { %v2267_v0 = vpop.eup %2266 }
 0x556   :  { %650 = vst.msk [vmem:[#allocation2 + $0x28] sm:$0xff] %vm39_vm1, %v2267_v0  ;;  %1991 = vmatmul.mubr.msk.f32.vlgmr.msra.gmra.mrb[8].mxu0 %vm39_vm1, %v2267_v0 }
 0x557   :  { %2187 = vmatpush3.bf16.msra.mxu0 %v2184_v56  ;;  %2012 = vmatprep.mubr.msk.f32.mxu0 %vm39_vm1, %v813_v1 }
 0x558   :  { %2189 = vmatprep.subr.bf16.mxu0 %v2188_v63 }
 0x55b   :  { %2191 = vmatpush3.bf16.msra.mxu0 %v2188_v63  ;;  %v1576_v63 = vld [vmem:[%s2724_s7 + $0x8] sm:$0xff] }
 0x55c   :  { %2204 = vmatprep.subr.bf16.mxu0 %v2313_v11  ;;  %v2240_v0 = vpack.c.bf16 %v1576_v63, %v1575_v62 }
 0x55d   :  { %v818_v6 = vld [vmem:[#allocation2 + $0x28] sm:$0xff] }
 0x55e   :  { %2013 = vmatmul.mubr.msk.f32.vlgmr.msra.gmra.mrb[10].mxu0 %vm39_vm1, %v814_v2 }
 0x55f   :  { %2015 = vmatprep.mubr.msk.f32.mxu0 %vm39_vm1, %v815_v3  ;;  %2206 = vmatpush3.bf16.msra.mxu0 %v2539_v10 }
 0x560   :  { %2207 = vmatprep.subr.bf16.mxu0 %v2313_v11 }
 0x562   :  { %2016 = vmatmul.mubr.msk.f32.gmra.mrb[12].mxu0 %vm39_vm1, %v816_v4  ;;  %v1578_v4 = vld [vmem:[%s2724_s7 + $0x18] sm:$0xff] }
 0x563   :  { %2018 = vmatprep.mubr.msk.f32.mxu0 %vm39_vm1, %v817_v5  ;;  %2209 = vmatpush3.bf16.msra.mxu0 %v2549_v14 }
 0x564   :  { %2216 = vmatprep.subr.bf16.mxu0 %v2313_v11 }
 0x566   :  { %2019 = vmatmul.mubr.msk.f32.gmra.mrb[14].mxu0 %vm39_vm1, %v818_v6 }
 0x629   :  { %v720_v16 = vpop.f32.mrb[8].mxu0 }
 0x62a   :  { %v724_v17 = vadd.f32 %v720_v16, %v185_v15  ;;  %v1992_v18 = vpop.f32.mrb[9].mxu0 }
 0x62c   :  { %2268 = vtanh.f32 %v724_v17 }
 0x631   :  { %v2014_v19 = vpop.f32.mrb[10].mxu0 }
 0x632   :  { %v917_v20 = vpop.f32.mrb[11].mxu0  ;;  %v923_v40 = vadd.f32 %v2014_v19, %v2582_v34  ;;  %v1777_v19 = vld [vmem:[%s2725_s8] ss:$0 sm:$0xff] }
 0x633   :  { %v918_v35 = vadd.f32 %v2582_v34, %v917_v20 }
 0x635   :  { %v2555_v21 = vpop.f32.mrb[12].mxu0 }
 0x636   :  { %v2269_v25 = vpop.eup %2268  ;;  %v927_v26 = vpop.f32.mrb[13].mxu0  ;;  %v933_v52 = vadd.f32 %v2555_v21, %v2582_v34 }
 0x637   :  { %726 = vst.msk [vmem:[#allocation2 + $0x30] sm:$0xff] %vm39_vm1, %v2269_v25  ;;  %2002 = vmatmul.mubr.msk.f32.vlgmr.msra.gmra.mrb[12].mxu1 %vm39_vm1, %v2269_v25  ;;  %v928_v47 = vadd.f32 %v2582_v34, %v927_v26 }
 0x638   :  { %2194 = vmatpush3.bf16.msra.mxu1 %v2539_v10  ;;  %2032 = vmatprep.mubr.msk.f32.mxu1 %vm2314_vm2, %v2312_v7 }
 0x639   :  { %v2562_v24 = vpop.f32.mrb[14].mxu0  ;;  %2195 = vmatprep.subr.bf16.mxu1 %v2313_v11 }
 0x63a   :  { %v2565_v27 = vpop.f32.mrb[15].mxu0  ;;  %v943_v1 = vadd.f32 %v2562_v24, %v2582_v34 }
 0x63b   :  { %v938_v57 = vadd.f32 %v2582_v34, %v2565_v27 }
 0x63c   :  { %2197 = vmatpush3.bf16.msra.mxu1 %v2549_v14 }
 0x63d   :  { %2198 = vmatprep.subr.bf16.mxu1 %v2313_v11 }
 0x63e   :  { %v819_v29 = vld [vmem:[#allocation2 + $0x30] sm:$0xff] }
 0x63f   :  { %2033 = vmatmul.mubr.msk.f32.vlgmr.msra.gmra.mrb[14].mxu1 %vm39_vm1, %v957_v28  ;;  %2021 = vmatprep.mubr.msk.f32.mxu0 %vm39_vm1, %v819_v29 }
 0x640   :  { %2200 = vmatpush3.bf16.msra.mxu1 %v2539_v10  ;;  %2043 = vmatprep.mubr.msk.f32.mxu1 %vm2314_vm2, %v2312_v7 }
 0x641   :  { %2201 = vmatprep.subr.bf16.mxu1 %v2313_v11 }
 0x644   :  { %2203 = vmatpush3.bf16.msra.mxu1 %v2549_v14 }
 0x645   :  { %2210 = vmatprep.subr.bf16.mxu1 %v2313_v11 }
 0x70a   :  { %v796_v31 = vpop.f32.mrb[12].mxu1 }
 0x70b   :  { %v800_v32 = vadd.f32 %v796_v31, %v190_v30  ;;  %v2003_v33 = vpop.f32.mrb[13].mxu1 }
 0x70d   :  { %2270 = vtanh.f32 %v800_v32 }
 0x712   :  { %v1027_v36 = vpop.f32.mrb[14].mxu1 }
 0x713   :  { %v1031_v37 = vadd.f32 %v1027_v36, %v918_v35  ;;  %v2034_v38 = vpop.f32.mrb[15].mxu1 }
 0x715   :  { %2272 = vtanh.f32 %v1031_v37 }
 0x717   :  { %v2271_v39 = vpop.eup %2270 }
 0x718   :  { %802 = vst.msk [vmem:[#allocation2 + $0x38] sm:$0xff] %vm39_vm1, %v2271_v39  ;;  %803 = vst.msk [vmem:[#allocation3] sm:$0xff] %vm39_vm1, %v2271_v39 }
 0x71f   :  { %v2273_v22 = vpop.eup %2272  ;;  %v820_v23 = vld [vmem:[#allocation2 + $0x38] sm:$0xff] }
 0x720   :  { %1033 = vst.msk [vmem:[#allocation2] sm:$0xff] %vm39_vm1, %v2273_v22  ;;  %2044 = vmatmul.mubr.msk.f32.vlgmr.msra.gmra.mrb[16].mxu1 %vm39_vm1, %v2273_v22  ;;  %2022 = vmatmul.mubr.msk.f32.gmra.mrb[16].mxu0 %vm39_vm1, %v820_v23 }
 0x721   :  { %2054 = vmatprep.mubr.msk.f32.mxu0 %vm2314_vm2, %v2312_v7  ;;  %2212 = vmatpush3.bf16.msra.mxu1 %v2539_v10 }
 0x722   :  { %2213 = vmatprep.subr.bf16.mxu1 %v2313_v11  ;;  %2065 = vmatprep.mubr.msk.f32.mxu1 %vm2314_vm2, %v2312_v7 }
 0x725   :  { %2215 = vmatpush3.bf16.msra.mxu1 %v2549_v14 }
 0x726   :  { %2222 = vmatprep.subr.bf16.mxu1 %v2313_v11 }
 0x727   :  { %v1567_v8 = vld [vmem:[#allocation2] sm:$0xff] }
 0x7f3   :  { %v1103_v41 = vpop.f32.mrb[16].mxu1  ;;  %v2599_v42 = vpop.f32.mrb[16].mxu0 }
 0x7f4   :  { %v1107_v43 = vadd.f32 %v1103_v41, %v923_v40  ;;  %v2045_v44 = vpop.f32.mrb[17].mxu1  ;;  %v2601_v45 = vpop.f32.mrb[17].mxu0  ;;  %v953_v37 = vadd.f32 %v2599_v42, %v2582_v34 }
 0x7f5   :  { %v948_v15 = vadd.f32 %v2582_v34, %v2601_v45 }
 0x7f6   :  { %2274 = vtanh.f32 %v1107_v43 }
 0x800   :  { %v2275_v46 = vpop.eup %2274 }
 0x801   :  { %1109 = vst.msk [vmem:[#allocation2 + $0x8] sm:$0xff] %vm39_vm1, %v2275_v46  ;;  %2055 = vmatmul.mubr.msk.f32.vlgmr.msra.gmra.mrb[18].mxu0 %vm39_vm1, %v2275_v46 }
 0x802   :  { %2218 = vmatpush3.bf16.msra.mxu0 %v2539_v10  ;;  %2076 = vmatprep.mubr.msk.f32.mxu0 %vm2314_vm2, %v2312_v7 }
 0x803   :  { %2219 = vmatprep.subr.bf16.mxu0 %v2313_v11 }
 0x806   :  { %2221 = vmatpush3.bf16.msra.mxu0 %v2549_v14 }
 0x807   :  { %2228 = vmatprep.subr.bf16.mxu0 %v2313_v11 }
 0x808   :  { %v1568_v9 = vld [vmem:[#allocation2 + $0x8] sm:$0xff] }
 0x8d4   :  { %v1179_v48 = vpop.f32.mrb[18].mxu0 }
 0x8d5   :  { %v1183_v49 = vadd.f32 %v1179_v48, %v928_v47  ;;  %v2056_v50 = vpop.f32.mrb[19].mxu0 }
 0x8d7   :  { %2276 = vtanh.f32 %v1183_v49 }
 0x8e1   :  { %v2277_v51 = vpop.eup %2276 }
 0x8e2   :  { %1185 = vst.msk [vmem:[#allocation2 + $0x10] sm:$0xff] %vm39_vm1, %v2277_v51  ;;  %2066 = vmatmul.mubr.msk.f32.vlgmr.msra.gmra.mrb[18].mxu1 %vm39_vm1, %v2277_v51 }
 0x8e3   :  { %2224 = vmatpush3.bf16.msra.mxu1 %v2539_v10  ;;  %2087 = vmatprep.mubr.msk.f32.mxu1 %vm2314_vm2, %v2312_v7 }
 0x8e4   :  { %2225 = vmatprep.subr.bf16.mxu1 %v2313_v11 }
 0x8e7   :  { %2227 = vmatpush3.bf16.msra.mxu1 %v2549_v14 }
 0x8e8   :  { %2234 = vmatprep.subr.bf16.mxu1 %v2313_v11 }
 0x9b5   :  { %v1255_v53 = vpop.f32.mrb[18].mxu1 }
 0x9b6   :  { %v1259_v54 = vadd.f32 %v1255_v53, %v933_v52  ;;  %v2067_v55 = vpop.f32.mrb[19].mxu1 }
 0x9b8   :  { %2278 = vtanh.f32 %v1259_v54 }
 0x9c2   :  { %v2279_v56 = vpop.eup %2278 }
 0x9c3   :  { %1261 = vst.msk [vmem:[#allocation2 + $0x18] sm:$0xff] %vm39_vm1, %v2279_v56  ;;  %2077 = vmatmul.mubr.msk.f32.vlgmr.msra.gmra.mrb[20].mxu0 %vm39_vm1, %v2279_v56 }
 0x9c4   :  { %2230 = vmatpush3.bf16.msra.mxu0 %v2539_v10  ;;  %2098 = vmatprep.mubr.msk.f32.mxu0 %vm2314_vm2, %v2312_v7 }
 0x9c5   :  { %2231 = vmatprep.subr.bf16.mxu0 %v2313_v11 }
 0x9c8   :  { %2233 = vmatpush3.bf16.msra.mxu0 %v2549_v14 }
 0x9c9   :  { %2241 = vmatprep.subr.bf16.mxu0 %v2240_v0 }
 0x9ca   :  { %v1570_v12 = vld [vmem:[#allocation2 + $0x18] sm:$0xff] }
 0xa96   :  { %v1331_v58 = vpop.f32.mrb[20].mxu0 }
 0xa97   :  { %v1335_v59 = vadd.f32 %v1331_v58, %v938_v57  ;;  %v2078_v60 = vpop.f32.mrb[21].mxu0 }
 0xa99   :  { %2280 = vtanh.f32 %v1335_v59 }
 0xaa3   :  { %v2281_v61 = vpop.eup %2280 }
 0xaa4   :  { %1337 = vst.msk [vmem:[#allocation2 + $0x20] sm:$0xff] %vm39_vm1, %v2281_v61  ;;  %2088 = vmatmul.mubr.msk.f32.vlgmr.msra.gmra.mrb[20].mxu1 %vm39_vm1, %v2281_v61 }
 0xaa5   :  { %2236 = vmatpush3.bf16.msra.mxu1 %v2539_v10  ;;  %2109 = vmatprep.mubr.msk.f32.mxu1 %vm2314_vm2, %v2312_v7  ;;  %v1569_v10 = vld [vmem:[#allocation2 + $0x10] sm:$0xff] }
 0xaa6   :  { %2237 = vmatprep.subr.bf16.mxu1 %v2313_v11  ;;  %v1577_v11 = vld [vmem:[%s2724_s7 + $0x10] sm:$0xff] }
 0xaa7   :  { %v2244_v5 = vpack.c.bf16 %v1578_v4, %v1577_v11 }
 0xaa9   :  { %2239 = vmatpush3.bf16.msra.mxu1 %v2549_v14 }
 0xaab   :  { %v1571_v13 = vld [vmem:[#allocation2 + $0x20] sm:$0xff] }
 0xb77   :  { %v1407_v2 = vpop.f32.mrb[20].mxu1 }
 0xb78   :  { %v1411_v3 = vadd.f32 %v1407_v2, %v943_v1  ;;  %v2089_v7 = vpop.f32.mrb[21].mxu1 }
 0xb7a   :  { %2282 = vtanh.f32 %v1411_v3 }
 0xb84   :  { %v2283_v6 = vpop.eup %2282 }
 0xb85   :  { %1413 = vst.msk [vmem:[#allocation2 + $0x28] sm:$0xff] %vm39_vm1, %v2283_v6  ;;  %2099 = vmatmul.mubr.msk.f32.vlgmr.msra.gmra.mrb[22].mxu0 %vm39_vm1, %v2283_v6 }
 0xb86   :  { %2243 = vmatpush3.bf16.msra.mxu0 %v2240_v0  ;;  %2120 = vmatprep.mubr.msk.f32.mxu0 %vm39_vm1, %v1567_v8 }
 0xb87   :  { %2245 = vmatprep.subr.bf16.mxu0 %v2244_v5 }
 0xb8a   :  { %2247 = vmatpush3.bf16.msra.mxu0 %v2244_v5 }
 0xb8c   :  { %v1572_v14 = vld [vmem:[#allocation2 + $0x28] sm:$0xff] }
 0xb8d   :  { %2121 = vmatmul.mubr.msk.f32.vlgmr.msra.gmra.mrb[24].mxu0 %vm39_vm1, %v1568_v9 }
 0xb8e   :  { %2123 = vmatprep.mubr.msk.f32.mxu0 %vm39_vm1, %v1569_v10 }
 0xb91   :  { %2124 = vmatmul.mubr.msk.f32.gmra.mrb[26].mxu0 %vm39_vm1, %v1570_v12 }
 0xb92   :  { %2126 = vmatprep.mubr.msk.f32.mxu0 %vm39_vm1, %v1571_v13 }
 0xb95   :  { %2127 = vmatmul.mubr.msk.f32.gmra.mrb[28].mxu0 %vm39_vm1, %v1572_v14 }
 0xc58   :  { %v1483_v16 = vpop.f32.mrb[22].mxu0 }
 0xc59   :  { %v1487_v17 = vadd.f32 %v1483_v16, %v948_v15  ;;  %v2100_v18 = vpop.f32.mrb[23].mxu0 }
 0xc5b   :  { %2284 = vtanh.f32 %v1487_v17 }
 0xc60   :  { %v2122_v20 = vpop.f32.mrb[24].mxu0 }
 0xc61   :  { %v1682_v21 = vadd.f32 %v2122_v20, %v1777_v19  ;;  %v1676_v25 = vpop.f32.mrb[25].mxu0 }
 0xc62   :  { %v1677_v26 = vadd.f32 %v1777_v19, %v1676_v25 }
 0xc63   :  { %1716 = vst.msk [vmem:[%s2726_s9 + $0x8] sm:$0xff] %vm63_vm0, %v1682_v21 }
 0xc64   :  { %1715 = vst.msk [vmem:[%s2726_s9] sm:$0xff] %vm63_vm0, %v1677_v26  ;;  %v2125_v24 = vpop.f32.mrb[26].mxu0 }
 0xc65   :  { %v2285_v27 = vpop.eup %2284  ;;  %v1692_v28 = vadd.f32 %v2125_v24, %v1777_v19  ;;  %v1686_v29 = vpop.f32.mrb[27].mxu0 }
 0xc66   :  { %1489 = vst.msk [vmem:[#allocation2 + $0x30] sm:$0xff] %vm39_vm1, %v2285_v27  ;;  %v1687_v30 = vadd.f32 %v1777_v19, %v1686_v29  ;;  %2110 = vmatmul.mubr.msk.f32.vlgmr.msra.gmra.mrb[22].mxu1 %vm39_vm1, %v2285_v27 }
 0xc67   :  { %1718 = vst.msk [vmem:[%s2726_s9 + $0x18] sm:$0xff] %vm63_vm0, %v1692_v28 }
 0xc68   :  { %1717 = vst.msk [vmem:[%s2726_s9 + $0x10] sm:$0xff] %vm63_vm0, %v1687_v30  ;;  %v2128_v31 = vpop.f32.mrb[28].mxu0 }
 0xc69   :  { %v1702_v32 = vadd.f32 %v2128_v31, %v1777_v19  ;;  %v1696_v33 = vpop.f32.mrb[29].mxu0 }
 0xc6a   :  { %v1697_v35 = vadd.f32 %v1777_v19, %v1696_v33 }
 0xc6b   :  { %1720 = vst.msk [vmem:[%s2726_s9 + $0x28] sm:$0xff] %vm63_vm0, %v1702_v32 }
 0xc6c   :  { %1719 = vst.msk [vmem:[%s2726_s9 + $0x20] sm:$0xff] %vm63_vm0, %v1697_v35 }
 0xc6d   :  { %v1573_v36 = vld [vmem:[#allocation2 + $0x30] sm:$0xff] }
 0xc6e   :  { %2129 = vmatprep.mubr.msk.f32.mxu0 %vm39_vm1, %v1573_v36 }
 0xd39   :  { %v1559_v38 = vpop.f32.mrb[22].mxu1 }
 0xd3a   :  { %v1563_v39 = vadd.f32 %v1559_v38, %v953_v37  ;;  %v2111_v22 = vpop.f32.mrb[23].mxu1 }
 0xd3c   :  { %2286 = vtanh.f32 %v1563_v39 }
 0xd46   :  { %v2287_v23 = vpop.eup %2286 }
 0xd47   :  { %1565 = vst.msk [vmem:[#allocation2 + $0x38] sm:$0xff] %vm39_vm1, %v2287_v23  ;;  %1566 = vst.msk [vmem:[#allocation3 + $0x8] sm:$0xff] %vm39_vm1, %v2287_v23 }
 0xd4e   :  { %v1574_v40 = vld [vmem:[#allocation2 + $0x38] sm:$0xff] }
 0xd4f   :  { %2130 = vmatmul.mubr.msk.f32.gmra.mrb[30].mxu0 %vm39_vm1, %v1574_v40 }
 0xd50   :  { %2299 = shalt.err (!%p2296_p4)
}
 0xd51   :  { %s2300_s5 = scalar_lea.hbm %s2727_s10, 256 }
 0xd52   :  { %p2301_p5 = scmp.ne.s32.totalorder %s2727_s10, %s2300_s5  ;;  %p2304_p6 = scmp.lt.u32.totalorder %s2300_s5, %s2727_s10 }
 0xd54   :  { %p2306_p7 = pnand %p2304_p6, %p2301_p5 }
 0xd56   :  { %2309 = shalt.err (!%p2306_p7)
}
 0xd57   :  { %s2316_s2 = smov 128   ;;  %s2317_s16 = smov 8  }
 0xd58   :  { %1736 = dma.vmem_to_hbm [thread:$0]  %s1731_s29, 256, %s2727_s10, [#allocation4], %s2316_s2, %s2316_s2, %s2317_s16  }
 0xe22   :  { %v2131_v34 = vpop.f32.mrb[30].mxu0 }
 0xe23   :  { %v1712_v41 = vadd.f32 %v2131_v34, %v1777_v19  ;;  %v1706_v42 = vpop.f32.mrb[31].mxu0 }
 0xe24   :  { %v1707_v43 = vadd.f32 %v1777_v19, %v1706_v42 }
 0xe25   :  { %1722 = vst.msk [vmem:[%s2726_s9 + $0x38] sm:$0xff] %vm63_vm0, %v1712_v41 }
 0xe26   :  { %1721 = vst.msk [vmem:[%s2726_s9 + $0x30] sm:$0xff] %vm63_vm0, %v1707_v43 }
 0xe27   :  { %2310 = dma.done.wait [#allocation4], 256  }
 0xe28   :  { %2311 = vsyncadd [#allocation4], 4294967040 }
 0xe29   :  { %1742 = vsyncpa [#allocation4], 1 }

</bundles_post_ra>
